<compile_context>
chip_gen: v5e
topology: v5e:2x2
jax: 0.10.0
libtpu: 0.0.40
codegen_flags: <defaults>
</compile_context>

<pallas_src>
import jax
import jax.numpy as jnp
from jax.experimental import pallas as pl
from jax.experimental.pallas import tpu as pltpu


def _cdiv(a, b):
    return -(-a // b)


def _tpu_hw_info():
    """Best-effort (vmem_capacity_bytes, num_tensorcores) with safe fallbacks."""
    cap = 64 * 1024 * 1024  # conservative: valid on every supported generation
    num_tc = 1
    try:
        info = pltpu.get_tpu_info()
        cap = int(getattr(info, "vmem_capacity_bytes", cap))
    except Exception:
        pass
    try:
        kind = jax.devices()[0].device_kind.lower()
    except Exception:
        kind = ""
    if "v7" in kind:
        num_tc = 2
        cap = min(cap, 64 * 1024 * 1024)  # 64 MiB per TensorCore on v7x
    return cap, num_tc


def _make_js_kernel(batch, block_b, steps, exact_lse_m):
    def kernel(p_ref, q_ref, o_ref, acc_ref):
        s = pl.program_id(0)
        i = pl.program_id(1)

        @pl.when(i == 0)
        def _():
            acc_ref[...] = jnp.zeros_like(acc_ref)

        p_raw = p_ref[...]
        q_raw = q_ref[...]

        # Row maxes in the input dtype (max is exact in bf16; halves vreg/vld
        # traffic on v6e/v7x).  Upcast only the exp argument to f32.
        max_p = jnp.max(p_raw, axis=-1, keepdims=True).astype(jnp.float32)
        max_q = jnp.max(q_raw, axis=-1, keepdims=True).astype(jnp.float32)

        lp = p_raw.astype(jnp.float32)
        lq = q_raw.astype(jnp.float32)

        ep = jnp.exp(lp - max_p)
        eq = jnp.exp(lq - max_q)
        lse_p = max_p + jnp.log(jnp.sum(ep, axis=-1, keepdims=True))
        lse_q = max_q + jnp.log(jnp.sum(eq, axis=-1, keepdims=True))

        if exact_lse_m:
            # Exact path: robust even for near-disjoint support.
            lm = 0.5 * (lp + lq)
            max_m = jnp.max(lm, axis=-1, keepdims=True)
            lse_m = max_m + jnp.log(
                jnp.sum(jnp.exp(lm - max_m), axis=-1, keepdims=True))
        else:
            # exp(lm - 0.5*(max_p+max_q)) == sqrt(ep*eq): reuses ep/eq and
            # deletes the lm tensor plus its max/sub/exp passes entirely.
            shift_m = 0.5 * (max_p + max_q)
            lse_m = shift_m + jnp.log(
                jnp.sum(jnp.sqrt(ep * eq), axis=-1, keepdims=True))

        contrib = lse_p + lse_q - 2.0 * lse_m  # (block_b, 1), per-row exact

        # Mask rows past the true batch size.  Ragged last block and the
        # clamped trailing step of the split axis read unspecified / duplicate
        # data, so those rows MUST contribute exactly 0.
        row0 = (s * steps + i) * block_b
        rows = row0 + jax.lax.broadcasted_iota(jnp.int32, (block_b, 1), 0)
        acc_ref[...] += jnp.where(rows < batch, contrib, 0.0)

        @pl.when(i == pl.num_programs(1) - 1)
        def _():
            # One cross-sublane reduce per split, once at the end; write a
            # lane-dense (8,128) tile (unmasked store).
            total = jnp.sum(acc_ref[...])
            o_ref[...] = jnp.broadcast_to(total, (8, 128)).astype(jnp.float32)

    return kernel


def js_div_loss_from_logits(logits_p, logits_q, *, block_b=None, num_splits=None,
                            exact_lse_m=False):
    """Scalar JS divergence (reduction='mean'), matching the PyTorch module."""
    assert logits_p.shape == logits_q.shape, (logits_p.shape, logits_q.shape)
    assert logits_p.ndim == 2, "expected (batch, classes) logits"
    B, C = logits_p.shape
    assert B >= 1 and C >= 1

    if logits_q.dtype != logits_p.dtype:
        logits_q = logits_q.astype(logits_p.dtype)
    itemsize = jnp.dtype(logits_p.dtype).itemsize
    # Sublane granularity: 8 rows for 4-byte dtypes, 16 for bf16, 32 for int8.
    row_mult = 8 * max(1, 4 // itemsize)

    vmem_cap, num_tc = _tpu_hw_info()
    # Leave ~25% of VMEM for compiler-internal scratch.
    vmem_budget = max(16 << 20, (vmem_cap // 4) * 3)

    if block_b is None:
        # Per-row VMEM working set:
        #   2 inputs x 2 pipeline buffers in the input dtype
        # + ~4 live f32 row temporaries (lp / lq / ep / eq / sqrt(ep*eq)).
        bytes_per_row = 2 * 2 * C * itemsize + 4 * C * 4
        rows_by_vmem = max(row_mult, (vmem_budget - (2 << 20)) // bytes_per_row)
        # ~8 MiB per input tile is already past the measured roofline knee.
        rows_by_target = max(row_mult, (8 << 20) // (C * itemsize))
        block_b = min(rows_by_vmem, rows_by_target, _cdiv(B, row_mult) * row_mult)
    block_b = max(row_mult, (block_b // row_mult) * row_mult)
    # TODO(synk): for C so large that one (row_mult, C) f32 working set exceeds
    # VMEM (~1M+ classes), add a trailing "arbitrary" grid axis over C with an
    # online running-max/running-sum logsumexp instead of full-width row tiles.

    nblocks = _cdiv(B, block_b)
    if num_splits is None:
        # One partial sum per TensorCore: 2 on v7x (megacore "parallel" axis),
        # 1 on single-TC v5e/v6e where an extra split is pure loop overhead.
        num_splits = num_tc if nblocks >= num_tc else 1
    num_splits = max(1, min(int(num_splits), nblocks))
    steps = _cdiv(nblocks, num_splits)

    # Explicit scoped-VMEM limit sized from the f32 working set (the default
    # scoped limit is 16-32 MiB; this is load-bearing especially on v5e).
    est = (2 * 2 * block_b * C * itemsize   # pipelined input buffers
           + 4 * block_b * C * 4            # f32 temporaries
           + block_b * 4 + (2 << 20))       # accumulator + slack
    vmem_limit = int(min(max(est, 32 << 20), vmem_budget))

    kernel = _make_js_kernel(B, block_b, steps, exact_lse_m)

    def in_index(s, i):
        # Clamp so the (fully masked) trailing step of the split axis never
        # produces an out-of-range block index.
        return (jnp.minimum(s * steps + i, nblocks - 1), 0)

    partials = pl.pallas_call(
        kernel,
        out_shape=jax.ShapeDtypeStruct((num_splits * 8, 128), jnp.float32),
        grid_spec=pltpu.PrefetchScalarGridSpec(
            num_scalar_prefetch=0,
            grid=(num_splits, steps),
            in_specs=[
                pl.BlockSpec((block_b, C), in_index),
                pl.BlockSpec((block_b, C), in_index),
            ],
            out_specs=pl.BlockSpec((8, 128), lambda s, i: (s, 0)),
            scratch_shapes=[pltpu.VMEM((block_b, 1), jnp.float32)],
        ),
        compiler_params=pltpu.CompilerParams(
            dimension_semantics=("parallel", "arbitrary"),
            vmem_limit_bytes=vmem_limit,
        ),
    )(logits_p, logits_q)

    # Every element of a split's (8,128) tile holds that split's sum; pick one.
    per_split = partials[0::8, 0]
    return 0.5 * jnp.sum(per_split) / float(B * C)


def _reference(logits_p, logits_q):
    m = jax.nn.log_softmax(0.5 * (logits_p + logits_q), axis=-1)
    p = jax.nn.log_softmax(logits_p, axis=-1)
    q = jax.nn.log_softmax(logits_q, axis=-1)
    a = jnp.mean(jnp.exp(m) * (m - p))
    b = jnp.mean(jnp.exp(m) * (m - q))
    return 0.5 * (a + b)


if __name__ == "__main__":
    key = jax.random.PRNGKey(0)
    kp, kq = jax.random.split(key)

    # Small demo shape: batch=16, classes=32.
    B, C = 16, 32
    logits_p = jax.random.normal(kp, (B, C), dtype=jnp.float32)
    logits_q = jax.random.normal(kq, (B, C), dtype=jnp.float32)

    loss = jax.block_until_ready(js_div_loss_from_logits(logits_p, logits_q))
    ref = _reference(logits_p, logits_q)
    assert jnp.allclose(loss, ref, rtol=1e-4, atol=2e-6), (loss, ref)

    # Ragged batch (not a multiple of 8): exercises the in-kernel row mask
    # (no wrapper-side padding copy anymore).
    loss2 = jax.block_until_ready(
        js_div_loss_from_logits(logits_p[:10], logits_q[:10]))
    ref2 = _reference(logits_p[:10], logits_q[:10])
    assert jnp.allclose(loss2, ref2, rtol=1e-4, atol=2e-6), (loss2, ref2)

    # Multi-block two-split grid with a ragged last block and a clamped
    # (fully masked) trailing step; also checks the exact-lse_m fallback path.
    B2, C2 = 150, 256
    kp2, kq2 = jax.random.split(jax.random.PRNGKey(1))
    lp2 = 4.0 * jax.random.normal(kp2, (B2, C2), dtype=jnp.float32)
    lq2 = 4.0 * jax.random.normal(kq2, (B2, C2), dtype=jnp.float32)
    ref3 = _reference(lp2, lq2)
    loss3 = jax.block_until_ready(
        js_div_loss_from_logits(lp2, lq2, block_b=32, num_splits=2))
    assert jnp.allclose(loss3, ref3, rtol=1e-4, atol=2e-6), (loss3, ref3)
    loss4 = jax.block_until_ready(
        js_div_loss_from_logits(lp2, lq2, block_b=32, num_splits=2,
                                exact_lse_m=True))
    assert jnp.allclose(loss4, ref3, rtol=1e-4, atol=2e-6), (loss4, ref3)

    print("KERNEL_OK")
</pallas_src>

<mosaic_0001>
module attributes {stable_mosaic.version = 11 : i64} {
  func.func @kernel(%arg0: i32, %arg1: i32, %arg2: memref<16x32xf32, #tpu.memory_space<vmem>>, %arg3: memref<16x32xf32, #tpu.memory_space<vmem>>, %arg4: memref<8x128xf32, #tpu.memory_space<vmem>>, %arg5: memref<16x1xf32, #tpu.memory_space<vmem>>) attributes {dimension_semantics = [#tpu.dimension_semantics<parallel>, #tpu.dimension_semantics<arbitrary>], iteration_bounds = array<i64: 1, 1>, scalar_prefetch = 0 : i64, scratch_operands = 1 : i64, tpu.core_type = #tpu.core_type<tc>, window_params = [{transform_indices = @transform_0, window_bounds = array<i64: 16, 32>}, {transform_indices = @transform_1, window_bounds = array<i64: 16, 32>}, {transform_indices = @transform_2, window_bounds = array<i64: 8, 128>}]} {
    %c0_i32 = arith.constant 0 : i32
    %0 = arith.cmpi eq, %arg1, %c0_i32 : i32
    %1 = arith.extui %0 : i1 to i32
    %c0_i32_0 = arith.constant 0 : i32
    %2 = arith.cmpi ne, %1, %c0_i32_0 : i32
    scf.if %2 {
      %cst_18 = arith.constant 0.000000e+00 : f32
      %52 = vector.broadcast %cst_18 : f32 to vector<16x1xf32>
      %c0_19 = arith.constant 0 : index
      %c0_20 = arith.constant 0 : index
      %53 = vector.load %arg5[%c0_19, %c0_20] : memref<16x1xf32, #tpu.memory_space<vmem>>, vector<16x1xf32>
      tpu.vector_store %arg5[%c0_19, %c0_20], %52 {strides = array<i32>} : memref<16x1xf32, #tpu.memory_space<vmem>>, vector<16x1xf32>,
    } else {
    }
    %c0 = arith.constant 0 : index
    %c0_1 = arith.constant 0 : index
    %3 = vector.load %arg2[%c0, %c0_1] : memref<16x32xf32, #tpu.memory_space<vmem>>, vector<16x32xf32>
    %c0_2 = arith.constant 0 : index
    %c0_3 = arith.constant 0 : index
    %4 = vector.load %arg3[%c0_2, %c0_3] : memref<16x32xf32, #tpu.memory_space<vmem>>, vector<16x32xf32>
    %cst = arith.constant dense<0xFF800000> : vector<16xf32>
    %5 = vector.multi_reduction <maximumf>, %3, %cst [1] : vector<16x32xf32> to vector<16xf32>
    %6 = vector.shape_cast %5 : vector<16xf32> to vector<16x1xf32>
    %cst_4 = arith.constant dense<0xFF800000> : vector<16xf32>
    %7 = vector.multi_reduction <maximumf>, %4, %cst_4 [1] : vector<16x32xf32> to vector<16xf32>
    %8 = vector.shape_cast %7 : vector<16xf32> to vector<16x1xf32>
    %9 = vector.broadcast %6 : vector<16x1xf32> to vector<16x32xf32>
    %10 = arith.subf %3, %9 : vector<16x32xf32>
    %11 = math.exp %10 : vector<16x32xf32>
    %12 = vector.broadcast %8 : vector<16x1xf32> to vector<16x32xf32>
    %13 = arith.subf %4, %12 : vector<16x32xf32>
    %14 = math.exp %13 : vector<16x32xf32>
    %cst_5 = arith.constant dense<0.000000e+00> : vector<16xf32>
    %15 = vector.multi_reduction <add>, %11, %cst_5 [1] : vector<16x32xf32> to vector<16xf32>
    %16 = vector.shape_cast %15 : vector<16xf32> to vector<16x1xf32>
    %17 = math.log %16 : vector<16x1xf32>
    %18 = arith.addf %6, %17 : vector<16x1xf32>
    %cst_6 = arith.constant dense<0.000000e+00> : vector<16xf32>
    %19 = vector.multi_reduction <add>, %14, %cst_6 [1] : vector<16x32xf32> to vector<16xf32>
    %20 = vector.shape_cast %19 : vector<16xf32> to vector<16x1xf32>
    %21 = math.log %20 : vector<16x1xf32>
    %22 = arith.addf %8, %21 : vector<16x1xf32>
    %23 = arith.addf %6, %8 : vector<16x1xf32>
    %cst_7 = arith.constant 5.000000e-01 : f32
    %24 = vector.broadcast %cst_7 : f32 to vector<16x1xf32>
    %25 = arith.mulf %24, %23 : vector<16x1xf32>
    %26 = arith.mulf %11, %14 : vector<16x32xf32>
    %27 = math.sqrt %26 : vector<16x32xf32>
    %cst_8 = arith.constant dense<0.000000e+00> : vector<16xf32>
    %28 = vector.multi_reduction <add>, %27, %cst_8 [1] : vector<16x32xf32> to vector<16xf32>
    %29 = vector.shape_cast %28 : vector<16xf32> to vector<16x1xf32>
    %30 = math.log %29 : vector<16x1xf32>
    %31 = arith.addf %25, %30 : vector<16x1xf32>
    %32 = arith.addf %18, %22 : vector<16x1xf32>
    %cst_9 = arith.constant 2.000000e+00 : f32
    %33 = vector.broadcast %cst_9 : f32 to vector<16x1xf32>
    %34 = arith.mulf %33, %31 : vector<16x1xf32>
    %35 = arith.subf %32, %34 : vector<16x1xf32>
    %c1_i32 = arith.constant 1 : i32
    %36 = arith.muli %arg0, %c1_i32 : i32
    %37 = arith.addi %36, %arg1 : i32
    %c16_i32 = arith.constant 16 : i32
    %38 = arith.muli %37, %c16_i32 : i32
    %39 = tpu.iota {dimensions = array<i32: 0>} : vector<16x1xi32>
    %40 = vector.broadcast %38 : i32 to vector<16x1xi32>
    %41 = arith.addi %40, %39 : vector<16x1xi32>
    %c0_10 = arith.constant 0 : index
    %c0_11 = arith.constant 0 : index
    %42 = vector.load %arg5[%c0_10, %c0_11] : memref<16x1xf32, #tpu.memory_space<vmem>>, vector<16x1xf32>
    %c16_i32_12 = arith.constant 16 : i32
    %43 = vector.broadcast %c16_i32_12 : i32 to vector<16x1xi32>
    %44 = arith.cmpi slt, %41, %43 : vector<16x1xi32>
    %cst_13 = arith.constant 0.000000e+00 : f32
    %45 = vector.broadcast %cst_13 : f32 to vector<16x1xf32>
    %46 = arith.select %44, %35, %45 : vector<16x1xi1>, vector<16x1xf32>
    %47 = arith.addf %42, %46 : vector<16x1xf32>
    %c0_14 = arith.constant 0 : index
    %c0_15 = arith.constant 0 : index
    %48 = vector.load %arg5[%c0_14, %c0_15] : memref<16x1xf32, #tpu.memory_space<vmem>>, vector<16x1xf32>
    tpu.vector_store %arg5[%c0_14, %c0_15], %47 {strides = array<i32>} : memref<16x1xf32, #tpu.memory_space<vmem>>, vector<16x1xf32>,
    %c0_i32_16 = arith.constant 0 : i32
    %49 = arith.cmpi eq, %arg1, %c0_i32_16 : i32
    %50 = arith.extui %49 : i1 to i32
    %c0_i32_17 = arith.constant 0 : i32
    %51 = arith.cmpi ne, %50, %c0_i32_17 : i32
    scf.if %51 {
      %c0_18 = arith.constant 0 : index
      %c0_19 = arith.constant 0 : index
      %52 = vector.load %arg5[%c0_18, %c0_19] : memref<16x1xf32, #tpu.memory_space<vmem>>, vector<16x1xf32>
      %53 = vector.shape_cast %52 : vector<16x1xf32> to vector<1x16x1xf32>
      %cst_20 = arith.constant dense<0.000000e+00> : vector<1xf32>
      %54 = vector.multi_reduction <add>, %53, %cst_20 [1, 2] : vector<1x16x1xf32> to vector<1xf32>
      %55 = vector.shape_cast %54 : vector<1xf32> to vector<1x1x1xf32>
      %56 = vector.extract %55[0, 0, 0] : f32 from vector<1x1x1xf32>
      %57 = vector.broadcast %56 : f32 to vector<8x128xf32>
      %c0_21 = arith.constant 0 : index
      %c0_22 = arith.constant 0 : index
      %58 = vector.load %arg4[%c0_21, %c0_22] : memref<8x128xf32, #tpu.memory_space<vmem>>, vector<8x128xf32>
      tpu.vector_store %arg4[%c0_21, %c0_22], %57 {strides = array<i32>} : memref<8x128xf32, #tpu.memory_space<vmem>>, vector<8x128xf32>,
    } else {
    }
    return
  }
  func.func @transform_0(%arg0: i32, %arg1: i32) -> (i32, i32) {
    %c1_i32 = arith.constant 1 : i32
    %0 = arith.muli %arg0, %c1_i32 : i32
    %1 = arith.addi %0, %arg1 : i32
    %c0_i32 = arith.constant 0 : i32
    %2 = arith.minsi %1, %c0_i32 : i32
    %c0_i32_0 = arith.constant 0 : i32
    %c0_i32_1 = arith.constant 0 : i32
    return %2, %c0_i32_0 : i32, i32
  }
  func.func @transform_1(%arg0: i32, %arg1: i32) -> (i32, i32) {
    %c1_i32 = arith.constant 1 : i32
    %0 = arith.muli %arg0, %c1_i32 : i32
    %1 = arith.addi %0, %arg1 : i32
    %c0_i32 = arith.constant 0 : i32
    %2 = arith.minsi %1, %c0_i32 : i32
    %c0_i32_0 = arith.constant 0 : i32
    %c0_i32_1 = arith.constant 0 : i32
    return %2, %c0_i32_0 : i32, i32
  }
  func.func @transform_2(%arg0: i32, %arg1: i32) -> (i32, i32) {
    %c0_i32 = arith.constant 0 : i32
    %c0_i32_0 = arith.constant 0 : i32
    return %arg0, %c0_i32 : i32, i32
  }
}

</mosaic_0001>

<bundles_post_ra>
// kernel: tpu_custom_call.1
= control target key start
LH: loop header
LB: loop body
LE: loop exit
PB: predicated region body
PF: predicated region fallthrough
CT: control target
= control target key end

     0   :  { %7 = vsyncpa [#allocation4], 0  ;;  %s408_s0 = inlined_call_operand.hbm [shape: f32[16,32], index: 0, kind: input, shape index: {}]   ;;  %s409_s1 = inlined_call_operand.hbm [shape: f32[16,32], index: 1, kind: input, shape index: {}]   ;;  %s410_s2 = inlined_call_operand.hbm [shape: f32[8,128], index: 2, kind: output, shape index: {}]  }
   0x1   :  { %8 = vsyncpa [#allocation7], 0 }
   0x2   :  { %9 = vsyncpa [#allocation5], 0  ;;  %s20_s11 = sshll.u32 %s408_s0, 4  ;;  %s342_s12 = smov [#allocation3]   ;;  %s21_s11 = int_to_ptr.hbm [resolvable:$true] %s20_s11 }
   0x3   :  { %s22_s13 = sshll.u32 %s342_s12, 4  ;;  %s39_s16 = sshll.u32 %s409_s1, 4  ;;  %s23_s13 = int_to_ptr.vmem [resolvable:$true] %s22_s13  ;;  %s40_s16 = int_to_ptr.hbm [resolvable:$true] %s39_s16 }
   0x4   :  { %s343_s17 = smov 128   ;;  %s344_s18 = smov 8  }
   0x5   :  { %28 = dma.hbm_to_vmem [thread:$0]  %s21_s11, 256, %s23_s13, [#allocation4], %s343_s17, %s343_s17, %s344_s18  }
   0x6   :  { %s345_s19 = smov [#allocation6]  }
   0x7   :  { %s41_s20 = sshll.u32 %s345_s19, 4  ;;  %s42_s20 = int_to_ptr.vmem [resolvable:$true] %s41_s20 }
   0x8   :  { %47 = dma.hbm_to_vmem [thread:$0]  %s40_s16, 256, %s42_s20, [#allocation7], %s343_s17, %s343_s17, %s344_s18  }
   0x9   :  { %336 = dma.done.wait [#allocation4], 256  }
   0xa   :  { %337 = vsyncadd [#allocation4], 4294967040 }
   0xb   :  { %338 = dma.done.wait [#allocation7], 256  }
   0xc   :  { %339 = vsyncadd [#allocation7], 4294967040  ;;  %vm75_vm0 = vcmask 261120   ;;  %v73_v0 = vld [vmem:[#allocation6] sm:$0xff]  ;;  %v71_v1 = vld [vmem:[#allocation3] sm:$0xff]  ;;  %vm68_vm5 = vcmask 7168  }
   0xd   :  { %v82_v2 = vsel %vm75_vm0, %v73_v0, -inf  ;;  %v76_v3 = vsel %vm75_vm0, %v71_v1, -inf  ;;  %v74_v4 = vld [vmem:[#allocation6 + $0x8] sm:$0xff]  ;;  %v72_v5 = vld [vmem:[#allocation3 + $0x8] sm:$0xff]  ;;  %v346_v52 = vmov 0.0   ;;  %s347_s0 = smov [#allocation8]  }
   0xe   :  { %83 = vmax.xlane.f32.xlu1 %v82_v2  ;;  %77 = vmax.xlane.f32.xlu0 %v76_v3  ;;  %v85_v6 = vsel %vm75_vm0, %v74_v4, -inf  ;;  %v79_v7 = vsel %vm75_vm0, %v72_v5, -inf  ;;  %69 = vst.msk [vmem:[#allocation2] sm:$0xff] %vm68_vm5, %v346_v52  ;;  %s215_s1 = sshll.u32 %s347_s0, 4  ;;  %s217_s23 = sshll.u32 %s410_s2, 4  ;;  %s216_s1 = int_to_ptr.vmem [resolvable:$true] %s215_s1  ;;  %s218_s23 = int_to_ptr.hbm [resolvable:$true] %s217_s23 }
   0xf   :  { %70 = vst.msk [vmem:[#allocation2 + $0x8] sm:$0xff] %vm68_vm5, %v346_v52 }
  0x16   :  { %86 = vmax.xlane.f32.xlu1 %v85_v6  ;;  %80 = vmax.xlane.f32.xlu0 %v79_v7 }
  0x81   :  { %v373_v8 = vpop.xlane.xlu1 %83  ;;  %v375_v9 = vpop.xlane.xlu0 %77 }
  0x82   :  { %v94_v10 = vsub.f32 %v73_v0, %v373_v8  ;;  %v88_v11 = vsub.f32 %v71_v1, %v375_v9  ;;  %v124_v60 = vadd.f32 %v373_v8, %v375_v9 }
  0x84   :  { %v96_v12 = vmul.f32 1.442695, %v94_v10  ;;  %v90_v13 = vmul.f32 1.442695, %v88_v11  ;;  %v126_v1 = vmul.f32 0.5, %v124_v60 }
  0x86   :  { %240 = vpow2.f32 %v96_v12 }
  0x87   :  { %242 = vpow2.f32 %v90_v13 }
  0x89   :  { %v379_v14 = vpop.xlane.xlu1 %86  ;;  %v381_v15 = vpop.xlane.xlu0 %80 }
  0x8a   :  { %v95_v16 = vsub.f32 %v74_v4, %v379_v14  ;;  %v89_v17 = vsub.f32 %v72_v5, %v381_v15  ;;  %v125_v10 = vadd.f32 %v379_v14, %v381_v15 }
  0x8c   :  { %v241_v18 = vpop.eup %240  ;;  %v98_v19 = vmul.f32 1.442695, %v95_v16  ;;  %v92_v20 = vmul.f32 1.442695, %v89_v17  ;;  %v180_v17 = vld [vmem:[#allocation2] sm:$0xff] }
  0x8d   :  { %v243_v21 = vpop.eup %242  ;;  %v112_v22 = vsel %vm75_vm0, %v241_v18, 0.0 }
  0x8e   :  { %v128_v23 = vmul.f32 %v243_v21, %v241_v18  ;;  %244 = vpow2.f32 %v98_v19  ;;  %113 = vadd.xlane.f32.xlu0 %v112_v22  ;;  %v100_v24 = vsel %vm75_vm0, %v243_v21, 0.0 }
  0x8f   :  { %246 = vpow2.f32 %v92_v20  ;;  %101 = vadd.xlane.f32.xlu2 %v100_v24  ;;  %v127_v20 = vmul.f32 0.5, %v125_v10 }
  0x90   :  { %248 = vrsqrt.f32 %v128_v23  ;;  %vm137_vm1 = vcmp.eq.f32.partialorder %v128_v23, inf  ;;  %v140_v40 = vand.u32 2147483648, %v128_v23  ;;  %vm139_vm2 = vcmp.eq.f32.partialorder %v128_v23, 0.0 }
  0x94   :  { %v245_v25 = vpop.eup %244 }
  0x95   :  { %v247_v26 = vpop.eup %246  ;;  %v115_v27 = vsel %vm75_vm0, %v245_v25, 0.0 }
  0x96   :  { %v249_v28 = vpop.eup %248  ;;  %v129_v29 = vmul.f32 %v247_v26, %v245_v25  ;;  %116 = vadd.xlane.f32.xlu1 %v115_v27  ;;  %v103_v30 = vsel %vm75_vm0, %v247_v26, 0.0  ;;  %v181_v26 = vld [vmem:[#allocation2 + $0x8] sm:$0xff] }
  0x97   :  { %104 = vadd.xlane.f32.xlu2 %v103_v30  ;;  %v131_v31 = vmul.f32 %v249_v28, %v128_v23 }
  0x98   :  { %250 = vrsqrt.f32 %v129_v29  ;;  %vm149_vm3 = vcmp.eq.f32.partialorder %v129_v29, inf  ;;  %v152_v48 = vand.u32 2147483648, %v129_v29  ;;  %vm151_vm4 = vcmp.eq.f32.partialorder %v129_v29, 0.0 }
  0x99   :  { %v132_v32 = vmul.f32 %v249_v28, %v131_v31 }
  0x9b   :  { %v133_v33 = vmul.f32 0.5, %v132_v32 }
  0x9d   :  { %v134_v34 = vsub.f32 1.5, %v133_v33 }
  0x9e   :  { %v251_v35 = vpop.eup %250 }
  0x9f   :  { %v135_v36 = vmul.f32 %v249_v28, %v134_v34  ;;  %v143_v37 = vmul.f32 %v251_v35, %v129_v29 }
  0xa1   :  { %v136_v38 = vmul.f32 %v135_v36, %v128_v23  ;;  %v144_v39 = vmul.f32 %v251_v35, %v143_v37 }
  0xa3   :  { %v138_v41 = vsel %vm137_vm1, %v128_v23, %v136_v38  ;;  %v145_v42 = vmul.f32 0.5, %v144_v39 }
  0xa4   :  { %v141_v43 = vsel %vm139_vm2, %v140_v40, %v138_v41 }
  0xa5   :  { %v154_v44 = vsel %vm75_vm0, %v141_v43, 0.0  ;;  %v146_v45 = vsub.f32 1.5, %v145_v42 }
  0xa6   :  { %155 = vadd.xlane.f32.xlu2 %v154_v44 }
  0xa7   :  { %v147_v46 = vmul.f32 %v251_v35, %v146_v45 }
  0xa9   :  { %v148_v47 = vmul.f32 %v147_v46, %v129_v29 }
  0xab   :  { %v150_v49 = vsel %vm149_vm3, %v129_v29, %v148_v47 }
  0xac   :  { %v153_v50 = vsel %vm151_vm4, %v152_v48, %v150_v49 }
  0xad   :  { %v157_v51 = vsel %vm75_vm0, %v153_v50, 0.0 }
  0xae   :  { %158 = vadd.xlane.f32.xlu0 %v157_v51 }
 0x101   :  { %v114_v54 = vpop.xlane.xlu0 %113 }
 0x102   :  { %v102_v53 = vpop.xlane.xlu2 %101  ;;  %252 = vlog2.f32 %v114_v54 }
 0x103   :  { %254 = vlog2.f32 %v102_v53 }
 0x108   :  { %v253_v57 = vpop.eup %252 }
 0x109   :  { %v117_v56 = vpop.xlane.xlu1 %116  ;;  %v255_v59 = vpop.eup %254  ;;  %v119_v62 = vmul.f32 0.6931472, %v253_v57 }
 0x10a   :  { %v105_v55 = vpop.xlane.xlu2 %104  ;;  %v107_v61 = vmul.f32 0.6931472, %v255_v59 }
 0x10b   :  { %v122_v3 = vadd.f32 %v119_v62, %v373_v8 }
 0x10c   :  { %v110_v2 = vadd.f32 %v107_v61, %v375_v9 }
 0x10e   :  { %v166_v11 = vadd.f32 %v122_v3, %v110_v2 }
 0x119   :  { %v156_v58 = vpop.xlane.xlu2 %155 }
 0x11a   :  { %256 = vlog2.f32 %v156_v58 }
 0x11b   :  { %258 = vlog2.f32 %v117_v56 }
 0x11c   :  { %260 = vlog2.f32 %v105_v55 }
 0x120   :  { %v257_v63 = vpop.eup %256 }
 0x121   :  { %v259_v0 = vpop.eup %258  ;;  %v161_v4 = vmul.f32 0.6931472, %v257_v63  ;;  %v159_v5 = vpop.xlane.xlu0 %158 }
 0x122   :  { %v261_v6 = vpop.eup %260  ;;  %262 = vlog2.f32 %v159_v5  ;;  %v121_v12 = vmul.f32 0.6931472, %v259_v0 }
 0x123   :  { %v164_v7 = vadd.f32 %v161_v4, %v126_v1  ;;  %v109_v13 = vmul.f32 0.6931472, %v261_v6 }
 0x124   :  { %v123_v9 = vadd.f32 %v121_v12, %v379_v14 }
 0x125   :  { %v168_v16 = vmul.f32 2.0, %v164_v7  ;;  %v111_v8 = vadd.f32 %v109_v13, %v381_v15 }
 0x127   :  { %v170_v18 = vsub.f32 %v166_v11, %v168_v16  ;;  %v167_v24 = vadd.f32 %v123_v9, %v111_v8 }
 0x128   :  { %v263_v19 = vpop.eup %262 }
 0x129   :  { %v186_v21 = vadd.f32 %v180_v17, %v170_v18  ;;  %v163_v22 = vmul.f32 0.6931472, %v263_v19 }
 0x12b   :  { %189 = vst.msk [vmem:[#allocation2] sm:$0xff] %vm68_vm5, %v186_v21  ;;  %v165_v23 = vadd.f32 %v163_v22, %v127_v20 }
 0x12d   :  { %v169_v25 = vmul.f32 2.0, %v165_v23 }
 0x12f   :  { %v171_v27 = vsub.f32 %v167_v24, %v169_v25 }
 0x131   :  { %v187_v28 = vadd.f32 %v181_v26, %v171_v27 }
 0x132   :  { %v194_v29 = vld [vmem:[#allocation2] sm:$0xff] }
 0x133   :  { %190 = vst.msk [vmem:[#allocation2 + $0x8] sm:$0xff] %vm68_vm5, %v187_v28  ;;  %v196_v31 = vsel %vm68_vm5, %v194_v29, 0.0 }
 0x13a   :  { %v195_v30 = vld [vmem:[#allocation2 + $0x8] sm:$0xff] }
 0x13b   :  { %v197_v14 = vsel %vm68_vm5, %v195_v30, 0.0 }
 0x13c   :  { %v198_v32 = vadd.f32 %v197_v14, %v196_v31 }
 0x13e   :  { %199 = vadd.xlane.f32.xlu1 %v198_v32 }
 0x1b1   :  { %v200_v15 = vpop.xlane.xlu1 %199 }
 0x1b2   :  { %v201_v33 = vrot.slane %v200_v15, 4 }
 0x1b4   :  { %v202_v34 = vadd.f32 %v201_v33, %v200_v15 }
 0x1b6   :  { %v203_v35 = vrot.slane %v202_v34, 2 }
 0x1b8   :  { %v204_v36 = vadd.f32 %v203_v35, %v202_v34 }
 0x1ba   :  { %v205_v37 = vrot.slane %v204_v36, 1 }
 0x1bc   :  { %v206_v38 = vadd.f32 %v205_v37, %v204_v36 }
 0x1be   :  { %232 = vpush %v206_v38 }
 0x1ef   :  { %s233_s24 = spop %232 }
 0x1f0   :  { %v208_v39 = vstv %s233_s24 }
 0x1f1   :  { %209 = vst [vmem:[#allocation8] sm:$0xff] %v208_v39 }
 0x1f2   :  { %220 = dma.vmem_to_hbm [thread:$0]  %s216_s1, 128, %s218_s23, [#allocation5]  }
 0x1f3   :  { %340 = dma.done.wait [#allocation5], 128  }
 0x1f4   :  { %341 = vsyncadd [#allocation5], 4294967168 }
 0x1f5   :  { %225 = vsyncpa [#allocation4], 1 }
 0x1f6   :  { %226 = vsyncpa [#allocation7], 1 }
 0x1f7   :  { %227 = vsyncpa [#allocation5], 1 }

</bundles_post_ra>
